<compile_context>
chip_gen: v6e
topology: v6e:2x2x1
jax: 0.10.0
libtpu: 0.0.40
codegen_flags: <defaults>
</compile_context>

<pallas_src>
import math
from functools import partial

import jax
import jax.numpy as jnp
from jax import lax
from jax.experimental import pallas as pl
from jax.experimental.pallas import tpu as pltpu

HIDDEN_DIM = 128
NUM_HEADS = 4
D_HEAD = HIDDEN_DIM // NUM_HEADS


def _pick_tile(n, target=256):
    """Largest multiple-of-8 tile <= target dividing n, else the full dim."""
    if n <= target:
        return n
    for t in range(min(n, target), 0, -8):
        if n % t == 0:
            return t
    return n


# ---------------------------------------------------------------------------
# Kernel 1: fused Q/K/V projections (row-tiled)
# ---------------------------------------------------------------------------
def _qkv_proj_kernel(xq_ref, xk_ref, xv_ref,
                     wq_ref, wk_ref, wv_ref,
                     bq_ref, bk_ref, bv_ref,
                     q_ref, k_ref, v_ref, *, scale):
    f32, bf16 = jnp.float32, jnp.bfloat16

    def proj(x_ref, w_ref, b_ref):
        acc = jnp.dot(x_ref[...].astype(bf16), w_ref[...].astype(bf16),
                      preferred_element_type=f32)
        return acc + b_ref[...]          # bias add in f32

    q = proj(xq_ref, wq_ref, bq_ref) * scale   # fold 1/sqrt(Dh) into Q
    k = proj(xk_ref, wk_ref, bk_ref)
    v = proj(xv_ref, wv_ref, bv_ref)
    q_ref[...] = q.astype(q_ref.dtype)
    k_ref[...] = k.astype(k_ref.dtype)
    v_ref[...] = v.astype(v_ref.dtype)


# ---------------------------------------------------------------------------
# Kernel 2: per-(head, batch) attention over q-row tiles
# ---------------------------------------------------------------------------
def _attn_kernel(q_ref, k_ref, v_ref, ctx_ref, attn_ref):
    # q_ref: (tq, Dh) bf16 (already scaled);  k_ref/v_ref: (S, Dh) bf16
    f32 = jnp.float32
    # scores = Q @ K^T, contracting the last dim of both (no explicit transpose)
    s = lax.dot_general(q_ref[...], k_ref[...],
                        dimension_numbers=(((1,), (1,)), ((), ())),
                        preferred_element_type=f32)            # (tq, S)
    # numerically stable softmax, all f32 on VPU/EUP
    m = jnp.max(s, axis=-1, keepdims=True)
    e = jnp.exp(s - m)
    inv = pl.reciprocal(jnp.sum(e, axis=-1, keepdims=True), approx=True)
    p = e * inv
    attn_ref[...] = p.astype(attn_ref.dtype)                   # (tq, S)
    ctx = jnp.dot(p.astype(v_ref.dtype), v_ref[...],
                  preferred_element_type=f32)                  # (tq, Dh)
    ctx_ref[...] = ctx.astype(ctx_ref.dtype)


# ---------------------------------------------------------------------------
# Wrapper — mirrors MultiHeadAttention.forward
# ---------------------------------------------------------------------------
def multi_head_attention(params, query, key, value, mask=None):
    """query/key/value: (B, S, d_model) f32.
    Returns: context (B, S, d_model) f32,
             attn    (num_heads*B, S, S) f32 (head-major, like the torch module)."""
    # TODO(synk): optional `mask` argument of the PyTorch module not implemented
    assert mask is None
    B, S, D = query.shape
    H, Dh = NUM_HEADS, D_HEAD
    BS = B * S

    # ---- stage 1: fused Q/K/V projections ---------------------------------
    tm = _pick_tile(BS, 256)
    n_m = BS // tm
    row_spec = pl.BlockSpec((tm, D), lambda i: (i, 0))
    w_spec = pl.BlockSpec((D, D), lambda i: (0, 0))     # weights stay resident
    b_spec = pl.BlockSpec((1, D), lambda i: (0, 0))

    q2d, k2d, v2d = pl.pallas_call(
        partial(_qkv_proj_kernel, scale=1.0 / math.sqrt(Dh)),
        grid=(n_m,),
        out_shape=(jax.ShapeDtypeStruct((BS, D), jnp.bfloat16),) * 3,
        in_specs=[row_spec, row_spec, row_spec,
                  w_spec, w_spec, w_spec,
                  b_spec, b_spec, b_spec],
        out_specs=(row_spec, row_spec, row_spec),
        compiler_params=pltpu.CompilerParams(
            dimension_semantics=("parallel",),
            vmem_limit_bytes=32 << 20),
    )(query.reshape(BS, D), key.reshape(BS, D), value.reshape(BS, D),
      params["wq"], params["wk"], params["wv"],
      params["bq"], params["bk"], params["bv"])

    # ---- head split: XLA layout plumbing (mirrors torch permute(2,0,1,3)) --
    def split_heads(x):
        return x.reshape(B, S, H, Dh).transpose(2, 0, 1, 3).reshape(H * B, S, Dh)

    qh, kh, vh = split_heads(q2d), split_heads(k2d), split_heads(v2d)

    # ---- stage 2: attention -------------------------------------------------
    tq = _pick_tile(S, 256)
    n_q = S // tq
    G = H * B

    ctx_h, attn = pl.pallas_call(
        _attn_kernel,
        grid=(G, n_q),
        out_shape=(jax.ShapeDtypeStruct((G, S, Dh), jnp.float32),
                   jax.ShapeDtypeStruct((G, S, S), jnp.float32)),
        in_specs=[pl.BlockSpec((None, tq, Dh), lambda g, i: (g, i, 0)),
                  pl.BlockSpec((None, S, Dh), lambda g, i: (g, 0, 0)),
                  pl.BlockSpec((None, S, Dh), lambda g, i: (g, 0, 0))],
        out_specs=(pl.BlockSpec((None, tq, Dh), lambda g, i: (g, i, 0)),
                   pl.BlockSpec((None, tq, S), lambda g, i: (g, i, 0))),
        compiler_params=pltpu.CompilerParams(
            dimension_semantics=("parallel", "parallel"),
            vmem_limit_bytes=48 << 20),
    )(qh, kh, vh)

    # ---- head re-merge (mirrors torch permute(1,2,0,3).view) ---------------
    context = ctx_h.reshape(H, B, S, Dh).transpose(1, 2, 0, 3).reshape(B, S, D)
    return context, attn


def init_params(key, d_model=HIDDEN_DIM):
    """nn.Linear-style init U(-1/sqrt(fan_in), 1/sqrt(fan_in)).
    Weights stored pre-transposed as (d_in, d_out); biases as (1, d_out)."""
    bound = 1.0 / math.sqrt(d_model)
    keys = jax.random.split(key, 6)
    u = lambda k, shape: jax.random.uniform(
        k, shape, jnp.float32, minval=-bound, maxval=bound)
    return {
        "wq": u(keys[0], (d_model, d_model)), "bq": u(keys[1], (1, d_model)),
        "wk": u(keys[2], (d_model, d_model)), "bk": u(keys[3], (1, d_model)),
        "wv": u(keys[4], (d_model, d_model)), "bv": u(keys[5], (1, d_model)),
    }


# ---------------------------------------------------------------------------
# Pure-JAX f32 reference (mirrors the torch module exactly) for validation
# ---------------------------------------------------------------------------
def _reference(params, query, key, value):
    B, S, D = query.shape
    H, Dh = NUM_HEADS, D_HEAD

    def proj(x, w, b):
        return (x.reshape(B * S, D) @ w + b).reshape(B, S, D)

    q = proj(query, params["wq"], params["bq"])
    k = proj(key, params["wk"], params["bk"])
    v = proj(value, params["wv"], params["bv"])

    def split(x):  # (B,S,H,Dh) -> permute(2,0,1,3) -> (H*B, S, Dh)
        return x.reshape(B, S, H, Dh).transpose(2, 0, 1, 3).reshape(H * B, S, Dh)

    qh, kh, vh = split(q), split(k), split(v)
    s = jnp.einsum("bqd,bkd->bqk", qh, kh) / math.sqrt(Dh)
    attn = jax.nn.softmax(s, axis=-1)
    ctx = jnp.einsum("bqk,bkd->bqd", attn, vh)
    context = ctx.reshape(H, B, S, Dh).transpose(1, 2, 0, 3).reshape(B, S, D)
    return context, attn


if __name__ == "__main__":
    B, S, D = 2, 8, HIDDEN_DIM
    root = jax.random.PRNGKey(0)
    kp, kq, kk, kv = jax.random.split(root, 4)
    params = init_params(kp)
    query = jax.random.normal(kq, (B, S, D), jnp.float32)
    key = jax.random.normal(kk, (B, S, D), jnp.float32)
    value = jax.random.normal(kv, (B, S, D), jnp.float32)

    context, attn = jax.jit(multi_head_attention)(params, query, key, value)
    jax.block_until_ready((context, attn))

    # shape parity with the torch module
    assert context.shape == (B, S, NUM_HEADS * D_HEAD)
    assert attn.shape == (B * NUM_HEADS, S, S)

    # numerical parity (tolerance covers bf16 MXU operands + EUP approx recip)
    ref_ctx, ref_attn = _reference(params, query, key, value)
    assert bool(jnp.allclose(attn, ref_attn, atol=1e-2, rtol=1e-2))
    assert bool(jnp.allclose(context, ref_ctx, atol=1e-2, rtol=1e-2))
    assert bool(jnp.allclose(jnp.sum(attn, axis=-1), 1.0, atol=5e-3))
    print("KERNEL_OK")
</pallas_src>

<mosaic_0001>
module attributes {stable_mosaic.version = 11 : i64} {
  func.func @_qkv_proj_kernel(%arg0: i32, %arg1: memref<16x128xf32, #tpu.memory_space<vmem>>, %arg2: memref<16x128xf32, #tpu.memory_space<vmem>>, %arg3: memref<16x128xf32, #tpu.memory_space<vmem>>, %arg4: memref<128x128xf32, #tpu.memory_space<vmem>>, %arg5: memref<128x128xf32, #tpu.memory_space<vmem>>, %arg6: memref<128x128xf32, #tpu.memory_space<vmem>>, %arg7: memref<1x128xf32, #tpu.memory_space<vmem>>, %arg8: memref<1x128xf32, #tpu.memory_space<vmem>>, %arg9: memref<1x128xf32, #tpu.memory_space<vmem>>, %arg10: memref<16x128xbf16, #tpu.memory_space<vmem>>, %arg11: memref<16x128xbf16, #tpu.memory_space<vmem>>, %arg12: memref<16x128xbf16, #tpu.memory_space<vmem>>) attributes {dimension_semantics = [#tpu.dimension_semantics<parallel>], iteration_bounds = array<i64: 1>, scalar_prefetch = 0 : i64, scratch_operands = 0 : i64, tpu.core_type = #tpu.core_type<tc>, window_params = [{transform_indices = @transform_0, window_bounds = array<i64: 16, 128>}, {transform_indices = @transform_1, window_bounds = array<i64: 16, 128>}, {transform_indices = @transform_2, window_bounds = array<i64: 16, 128>}, {pipeline_mode = #tpu.pipeline_mode<synchronous>, transform_indices = @transform_3, window_bounds = array<i64: 128, 128>}, {pipeline_mode = #tpu.pipeline_mode<synchronous>, transform_indices = @transform_4, window_bounds = array<i64: 128, 128>}, {pipeline_mode = #tpu.pipeline_mode<synchronous>, transform_indices = @transform_5, window_bounds = array<i64: 128, 128>}, {pipeline_mode = #tpu.pipeline_mode<synchronous>, transform_indices = @transform_6, window_bounds = array<i64: 1, 128>}, {pipeline_mode = #tpu.pipeline_mode<synchronous>, transform_indices = @transform_7, window_bounds = array<i64: 1, 128>}, {pipeline_mode = #tpu.pipeline_mode<synchronous>, transform_indices = @transform_8, window_bounds = array<i64: 1, 128>}, {transform_indices = @transform_9, window_bounds = array<i64: 16, 128>}, {transform_indices = @transform_10, window_bounds = array<i64: 16, 128>}, {transform_indices = @transform_11, window_bounds = array<i64: 16, 128>}]} {
    %c0 = arith.constant 0 : index
    %c0_0 = arith.constant 0 : index
    %0 = vector.load %arg1[%c0, %c0_0] : memref<16x128xf32, #tpu.memory_space<vmem>>, vector<16x128xf32>
    %1 = arith.truncf %0 : vector<16x128xf32> to vector<16x128xbf16>
    %c0_1 = arith.constant 0 : index
    %c0_2 = arith.constant 0 : index
    %2 = vector.load %arg4[%c0_1, %c0_2] : memref<128x128xf32, #tpu.memory_space<vmem>>, vector<128x128xf32>
    %3 = arith.truncf %2 : vector<128x128xf32> to vector<128x128xbf16>
    %cst = arith.constant dense<0.000000e+00> : vector<16x128xf32>
    %4 = tpu.matmul %1, %3, %cst {dimension_numbers = #tpu.dot_dimension_numbers<[1], [0], [0], [1], [0, 0, 1, 1], [], []>} : vector<16x128xbf16>, vector<128x128xbf16>, vector<16x128xf32> -> vector<16x128xf32>
    %c0_3 = arith.constant 0 : index
    %c0_4 = arith.constant 0 : index
    %5 = vector.load %arg7[%c0_3, %c0_4] : memref<1x128xf32, #tpu.memory_space<vmem>>, vector<1x128xf32>
    %6 = vector.broadcast %5 : vector<1x128xf32> to vector<16x128xf32>
    %7 = arith.addf %4, %6 : vector<16x128xf32>
    %cst_5 = arith.constant 0.176776692 : f32
    %8 = vector.broadcast %cst_5 : f32 to vector<16x128xf32>
    %9 = arith.mulf %7, %8 : vector<16x128xf32>
    %c0_6 = arith.constant 0 : index
    %c0_7 = arith.constant 0 : index
    %10 = vector.load %arg2[%c0_6, %c0_7] : memref<16x128xf32, #tpu.memory_space<vmem>>, vector<16x128xf32>
    %11 = arith.truncf %10 : vector<16x128xf32> to vector<16x128xbf16>
    %c0_8 = arith.constant 0 : index
    %c0_9 = arith.constant 0 : index
    %12 = vector.load %arg5[%c0_8, %c0_9] : memref<128x128xf32, #tpu.memory_space<vmem>>, vector<128x128xf32>
    %13 = arith.truncf %12 : vector<128x128xf32> to vector<128x128xbf16>
    %cst_10 = arith.constant dense<0.000000e+00> : vector<16x128xf32>
    %14 = tpu.matmul %11, %13, %cst_10 {dimension_numbers = #tpu.dot_dimension_numbers<[1], [0], [0], [1], [0, 0, 1, 1], [], []>} : vector<16x128xbf16>, vector<128x128xbf16>, vector<16x128xf32> -> vector<16x128xf32>
    %c0_11 = arith.constant 0 : index
    %c0_12 = arith.constant 0 : index
    %15 = vector.load %arg8[%c0_11, %c0_12] : memref<1x128xf32, #tpu.memory_space<vmem>>, vector<1x128xf32>
    %16 = vector.broadcast %15 : vector<1x128xf32> to vector<16x128xf32>
    %17 = arith.addf %14, %16 : vector<16x128xf32>
    %c0_13 = arith.constant 0 : index
    %c0_14 = arith.constant 0 : index
    %18 = vector.load %arg3[%c0_13, %c0_14] : memref<16x128xf32, #tpu.memory_space<vmem>>, vector<16x128xf32>
    %19 = arith.truncf %18 : vector<16x128xf32> to vector<16x128xbf16>
    %c0_15 = arith.constant 0 : index
    %c0_16 = arith.constant 0 : index
    %20 = vector.load %arg6[%c0_15, %c0_16] : memref<128x128xf32, #tpu.memory_space<vmem>>, vector<128x128xf32>
    %21 = arith.truncf %20 : vector<128x128xf32> to vector<128x128xbf16>
    %cst_17 = arith.constant dense<0.000000e+00> : vector<16x128xf32>
    %22 = tpu.matmul %19, %21, %cst_17 {dimension_numbers = #tpu.dot_dimension_numbers<[1], [0], [0], [1], [0, 0, 1, 1], [], []>} : vector<16x128xbf16>, vector<128x128xbf16>, vector<16x128xf32> -> vector<16x128xf32>
    %c0_18 = arith.constant 0 : index
    %c0_19 = arith.constant 0 : index
    %23 = vector.load %arg9[%c0_18, %c0_19] : memref<1x128xf32, #tpu.memory_space<vmem>>, vector<1x128xf32>
    %24 = vector.broadcast %23 : vector<1x128xf32> to vector<16x128xf32>
    %25 = arith.addf %22, %24 : vector<16x128xf32>
    %26 = arith.truncf %9 : vector<16x128xf32> to vector<16x128xbf16>
    %c0_20 = arith.constant 0 : index
    %c0_21 = arith.constant 0 : index
    %27 = vector.load %arg10[%c0_20, %c0_21] : memref<16x128xbf16, #tpu.memory_space<vmem>>, vector<16x128xbf16>
    tpu.vector_store %arg10[%c0_20, %c0_21], %26 {strides = array<i32>} : memref<16x128xbf16, #tpu.memory_space<vmem>>, vector<16x128xbf16>,
    %28 = arith.truncf %17 : vector<16x128xf32> to vector<16x128xbf16>
    %c0_22 = arith.constant 0 : index
    %c0_23 = arith.constant 0 : index
    %29 = vector.load %arg11[%c0_22, %c0_23] : memref<16x128xbf16, #tpu.memory_space<vmem>>, vector<16x128xbf16>
    tpu.vector_store %arg11[%c0_22, %c0_23], %28 {strides = array<i32>} : memref<16x128xbf16, #tpu.memory_space<vmem>>, vector<16x128xbf16>,
    %30 = arith.truncf %25 : vector<16x128xf32> to vector<16x128xbf16>
    %c0_24 = arith.constant 0 : index
    %c0_25 = arith.constant 0 : index
    %31 = vector.load %arg12[%c0_24, %c0_25] : memref<16x128xbf16, #tpu.memory_space<vmem>>, vector<16x128xbf16>
    tpu.vector_store %arg12[%c0_24, %c0_25], %30 {strides = array<i32>} : memref<16x128xbf16, #tpu.memory_space<vmem>>, vector<16x128xbf16>,
    return
  }
  func.func @transform_0(%arg0: i32) -> (i32, i32) {
    %c0_i32 = arith.constant 0 : i32
    %c0_i32_0 = arith.constant 0 : i32
    return %arg0, %c0_i32 : i32, i32
  }
  func.func @transform_1(%arg0: i32) -> (i32, i32) {
    %c0_i32 = arith.constant 0 : i32
    %c0_i32_0 = arith.constant 0 : i32
    return %arg0, %c0_i32 : i32, i32
  }
  func.func @transform_2(%arg0: i32) -> (i32, i32) {
    %c0_i32 = arith.constant 0 : i32
    %c0_i32_0 = arith.constant 0 : i32
    return %arg0, %c0_i32 : i32, i32
  }
  func.func @transform_3(%arg0: i32) -> (i32, i32) {
    %c0_i32 = arith.constant 0 : i32
    %c0_i32_0 = arith.constant 0 : i32
    %c0_i32_1 = arith.constant 0 : i32
    return %c0_i32, %c0_i32_0 : i32, i32
  }
  func.func @transform_4(%arg0: i32) -> (i32, i32) {
    %c0_i32 = arith.constant 0 : i32
    %c0_i32_0 = arith.constant 0 : i32
    %c0_i32_1 = arith.constant 0 : i32
    return %c0_i32, %c0_i32_0 : i32, i32
  }
  func.func @transform_5(%arg0: i32) -> (i32, i32) {
    %c0_i32 = arith.constant 0 : i32
    %c0_i32_0 = arith.constant 0 : i32
    %c0_i32_1 = arith.constant 0 : i32
    return %c0_i32, %c0_i32_0 : i32, i32
  }
  func.func @transform_6(%arg0: i32) -> (i32, i32) {
    %c0_i32 = arith.constant 0 : i32
    %c0_i32_0 = arith.constant 0 : i32
    %c0_i32_1 = arith.constant 0 : i32
    return %c0_i32, %c0_i32_0 : i32, i32
  }
  func.func @transform_7(%arg0: i32) -> (i32, i32) {
    %c0_i32 = arith.constant 0 : i32
    %c0_i32_0 = arith.constant 0 : i32
    %c0_i32_1 = arith.constant 0 : i32
    return %c0_i32, %c0_i32_0 : i32, i32
  }
  func.func @transform_8(%arg0: i32) -> (i32, i32) {
    %c0_i32 = arith.constant 0 : i32
    %c0_i32_0 = arith.constant 0 : i32
    %c0_i32_1 = arith.constant 0 : i32
    return %c0_i32, %c0_i32_0 : i32, i32
  }
  func.func @transform_9(%arg0: i32) -> (i32, i32) {
    %c0_i32 = arith.constant 0 : i32
    %c0_i32_0 = arith.constant 0 : i32
    return %arg0, %c0_i32 : i32, i32
  }
  func.func @transform_10(%arg0: i32) -> (i32, i32) {
    %c0_i32 = arith.constant 0 : i32
    %c0_i32_0 = arith.constant 0 : i32
    return %arg0, %c0_i32 : i32, i32
  }
  func.func @transform_11(%arg0: i32) -> (i32, i32) {
    %c0_i32 = arith.constant 0 : i32
    %c0_i32_0 = arith.constant 0 : i32
    return %arg0, %c0_i32 : i32, i32
  }
}

module attributes {stable_mosaic.version = 11 : i64} {
  func.func @_attn_kernel(%arg0: i32, %arg1: i32, %arg2: memref<1x8x32xbf16, #tpu.memory_space<vmem>>, %arg3: memref<1x8x32xbf16, #tpu.memory_space<vmem>>, %arg4: memref<1x8x32xbf16, #tpu.memory_space<vmem>>, %arg5: memref<1x8x32xf32, #tpu.memory_space<vmem>>, %arg6: memref<1x8x8xf32, #tpu.memory_space<vmem>>) attributes {dimension_semantics = [#tpu.dimension_semantics<parallel>, #tpu.dimension_semantics<parallel>], iteration_bounds = array<i64: 8, 1>, scalar_prefetch = 0 : i64, scratch_operands = 0 : i64, tpu.core_type = #tpu.core_type<tc>, window_params = [{transform_indices = @transform_0, window_bounds = array<i64: 1, 8, 32>}, {transform_indices = @transform_1, window_bounds = array<i64: 1, 8, 32>}, {transform_indices = @transform_2, window_bounds = array<i64: 1, 8, 32>}, {transform_indices = @transform_3, window_bounds = array<i64: 1, 8, 32>}, {transform_indices = @transform_4, window_bounds = array<i64: 1, 8, 8>}]} {
    %c0 = arith.constant 0 : index
    %c0_0 = arith.constant 0 : index
    %c0_1 = arith.constant 0 : index
    %0 = vector.load %arg2[%c0, %c0_0, %c0_1] : memref<1x8x32xbf16, #tpu.memory_space<vmem>>, vector<1x8x32xbf16>
    %1 = vector.shape_cast %0 : vector<1x8x32xbf16> to vector<8x32xbf16>
    %c0_2 = arith.constant 0 : index
    %c0_3 = arith.constant 0 : index
    %c0_4 = arith.constant 0 : index
    %2 = vector.load %arg3[%c0_2, %c0_3, %c0_4] : memref<1x8x32xbf16, #tpu.memory_space<vmem>>, vector<1x8x32xbf16>
    %3 = vector.shape_cast %2 : vector<1x8x32xbf16> to vector<8x32xbf16>
    %cst = arith.constant dense<0.000000e+00> : vector<8x8xf32>
    %4 = tpu.matmul %1, %3, %cst {dimension_numbers = #tpu.dot_dimension_numbers<[1], [1], [0], [0], [0, 0, 1, 0], [], []>} : vector<8x32xbf16>, vector<8x32xbf16>, vector<8x8xf32> -> vector<8x8xf32>
    %cst_5 = arith.constant dense<0xFF800000> : vector<8xf32>
    %5 = vector.multi_reduction <maximumf>, %4, %cst_5 [1] : vector<8x8xf32> to vector<8xf32>
    %6 = vector.shape_cast %5 : vector<8xf32> to vector<8x1xf32>
    %7 = vector.broadcast %6 : vector<8x1xf32> to vector<8x8xf32>
    %8 = arith.subf %4, %7 : vector<8x8xf32>
    %9 = math.exp %8 : vector<8x8xf32>
    %cst_6 = arith.constant dense<0.000000e+00> : vector<8xf32>
    %10 = vector.multi_reduction <add>, %9, %cst_6 [1] : vector<8x8xf32> to vector<8xf32>
    %11 = vector.shape_cast %10 : vector<8xf32> to vector<8x1xf32>
    %12 = tpu.reciprocal %11 {approx = true} : vector<8x1xf32> -> vector<8x1xf32>
    %13 = vector.broadcast %12 : vector<8x1xf32> to vector<8x8xf32>
    %14 = arith.mulf %9, %13 : vector<8x8xf32>
    %c0_7 = arith.constant 0 : index
    %c0_8 = arith.constant 0 : index
    %c0_9 = arith.constant 0 : index
    %15 = vector.load %arg6[%c0_7, %c0_8, %c0_9] : memref<1x8x8xf32, #tpu.memory_space<vmem>>, vector<1x8x8xf32>
    %16 = vector.shape_cast %15 : vector<1x8x8xf32> to vector<8x8xf32>
    %17 = vector.shape_cast %14 : vector<8x8xf32> to vector<1x8x8xf32>
    tpu.vector_store %arg6[%c0_7, %c0_8, %c0_9], %17 {strides = array<i32>} : memref<1x8x8xf32, #tpu.memory_space<vmem>>, vector<1x8x8xf32>,
    %18 = arith.truncf %14 : vector<8x8xf32> to vector<8x8xbf16>
    %c0_10 = arith.constant 0 : index
    %c0_11 = arith.constant 0 : index
    %c0_12 = arith.constant 0 : index
    %19 = vector.load %arg4[%c0_10, %c0_11, %c0_12] : memref<1x8x32xbf16, #tpu.memory_space<vmem>>, vector<1x8x32xbf16>
    %20 = vector.shape_cast %19 : vector<1x8x32xbf16> to vector<8x32xbf16>
    %cst_13 = arith.constant dense<0.000000e+00> : vector<8x32xf32>
    %21 = tpu.matmul %18, %20, %cst_13 {dimension_numbers = #tpu.dot_dimension_numbers<[1], [0], [0], [1], [0, 0, 1, 1], [], []>} : vector<8x8xbf16>, vector<8x32xbf16>, vector<8x32xf32> -> vector<8x32xf32>
    %c0_14 = arith.constant 0 : index
    %c0_15 = arith.constant 0 : index
    %c0_16 = arith.constant 0 : index
    %22 = vector.load %arg5[%c0_14, %c0_15, %c0_16] : memref<1x8x32xf32, #tpu.memory_space<vmem>>, vector<1x8x32xf32>
    %23 = vector.shape_cast %22 : vector<1x8x32xf32> to vector<8x32xf32>
    %24 = vector.shape_cast %21 : vector<8x32xf32> to vector<1x8x32xf32>
    tpu.vector_store %arg5[%c0_14, %c0_15, %c0_16], %24 {strides = array<i32>} : memref<1x8x32xf32, #tpu.memory_space<vmem>>, vector<1x8x32xf32>,
    return
  }
  func.func @transform_0(%arg0: i32, %arg1: i32) -> (i32, i32, i32) {
    %c0_i32 = arith.constant 0 : i32
    %c0_i32_0 = arith.constant 0 : i32
    return %arg0, %arg1, %c0_i32 : i32, i32, i32
  }
  func.func @transform_1(%arg0: i32, %arg1: i32) -> (i32, i32, i32) {
    %c0_i32 = arith.constant 0 : i32
    %c0_i32_0 = arith.constant 0 : i32
    %c0_i32_1 = arith.constant 0 : i32
    return %arg0, %c0_i32, %c0_i32_0 : i32, i32, i32
  }
  func.func @transform_2(%arg0: i32, %arg1: i32) -> (i32, i32, i32) {
    %c0_i32 = arith.constant 0 : i32
    %c0_i32_0 = arith.constant 0 : i32
    %c0_i32_1 = arith.constant 0 : i32
    return %arg0, %c0_i32, %c0_i32_0 : i32, i32, i32
  }
  func.func @transform_3(%arg0: i32, %arg1: i32) -> (i32, i32, i32) {
    %c0_i32 = arith.constant 0 : i32
    %c0_i32_0 = arith.constant 0 : i32
    return %arg0, %arg1, %c0_i32 : i32, i32, i32
  }
  func.func @transform_4(%arg0: i32, %arg1: i32) -> (i32, i32, i32) {
    %c0_i32 = arith.constant 0 : i32
    %c0_i32_0 = arith.constant 0 : i32
    return %arg0, %arg1, %c0_i32 : i32, i32, i32
  }
}

</mosaic_0001>

<bundles_post_ra>
// kernel: multi_head_attention.3
= control target key start
LH: loop header
LB: loop body
LE: loop exit
PB: predicated region body
PF: predicated region fallthrough
CT: control target
= control target key end

     0   :  { %10 = vsyncpa [#allocation3], 0  ;;  %s853_s0 = inlined_call_operand.vmem [shape: bf16[8,8,32], index: 0, kind: input, shape index: {}]   ;;  %s854_s1 = inlined_call_operand.vmem [shape: bf16[8,8,32], index: 1, kind: input, shape index: {}]   ;;  %s855_s2 = inlined_call_operand.vmem [shape: bf16[8,8,32], index: 2, kind: input, shape index: {}]   ;;  %s856_s3 = inlined_call_operand.vmem [shape: f32[8,8,32], index: 3, kind: output, shape index: {0}]   ;;  %s857_s4 = inlined_call_operand.hbm [shape: f32[8,8,8], index: 4, kind: output, shape index: {1}]  }
   0x1   :  { %12 = vsyncpa [#allocation3 + $0x1], 0  ;;  %s734_s15 = smov 0   ;;  %s736_s16 = smov 0  }
   0x2   :  { %s738_s17 = smov 0   ;;  %s740_s18 = smov 0  }
   0x3   :  { %s742_s19 = smov 0   ;;  %s744_s20 = smov 0  }
   0x4 LB: > { %s535_s21 = sadd.s32 4294967295, %s704_s20   ;;  %s536_s22 = sadd.s32 4294967294, %s704_s20   ;;  %s704_s20 = sphi %s744_s20, %s18_s20   ;;  %s700_s19 = sphi %s742_s19, %s864_s19   ;;  %s696_s18 = sphi %s740_s18, %s863_s18   ;;  %s692_s17 = sphi %s738_s17, %s862_s17   ;;  %s688_s16 = sphi %s736_s16, %s861_s16   ;;  %s684_s15 = sphi %s734_s15, %s860_s15  }
   0x5   : > { %s30_s23 = sadd.s32 1, %s700_s19  ;;  %s147_s24 = sadd.s32 1, %s692_s17 }
   0x6   : > { %p32_p0 = scmp.ge.s32.totalorder %s30_s23, 8  ;;  %p157_p1 = scmp.ne.s32.totalorder %s692_s17, %s688_s16 }
   0x7   : > { %p158_p2 = scmp.eq.s32.totalorder %s535_s21, 7  ;;  %p163_p3 = scmp.ne.s32.totalorder %s688_s16, %s684_s15 }
   0x8   : > { %s866_s23 = smov (%p32_p0, %s30_s23), 0  ;;  %p164_p5 = scmp.eq.s32.totalorder %s536_s22, 7 }
   0x9   : > { %p774_p4 = por %p158_p2, %p157_p1  ;;  %s142_s26 = ssub.s32 %s700_s19, %s866_s23 }
   0xa   : > { %p539_p6 = scmp.ge.s32.totalorder %s704_s20, 1  ;;  %p145_p7 = scmp.eq.s32.totalorder %s142_s26, 0 }
   0xb   : > { %p781_p8 = por %p164_p5, %p163_p3  ;;  %p206_p9 = scmp.lt.s32.totalorder %s704_s20, 9 }
   0xc   : > { %s787_s28 = scalar_select %p145_p7, %s692_s17, %s147_s24  }
   0xd   : > { %p207_p10 = pnand %p539_p6, %p206_p9 }
   0xe   : > { %p249_p11 = scmp.lt.s32.totalorder (!%p207_p10), %s696_s18, 7  ;;  %s246_s14 = sand.u32 (!%p207_p10), 1, %s688_s16  }
   0xf   : > { %210 = sbr.rel (%p207_p10) target bundleno = 739 (0x2e3), region = 32  ;;  %s540_s21 = sshll.u32 (!%p207_p10), %s246_s14, 3 }
  0x10   : > { %s248_s22 = scalar_lea.vmem (!%p207_p10), [#allocation2], %s540_s21  ;;  %s548_s24 = sshll.u32 (!%p207_p10), %s696_s18, 7 }
  0x11   : > { %s409_s26 = sshll.u32 (!%p207_p10), %s248_s22, 4  ;;  %s407_s6 = scalar_lea.hbm (!%p207_p10), %s857_s4, %s548_s24  ;;  %s410_s26 = int_to_ptr.vmem [resolvable:$true] %s409_s26 }
  0x12   : > { %s628_s8 = scalar_lea.vmem (!%p207_p10), %s410_s26, 128  ;;  %s708_s9 = smov (!%p207_p10), [#allocation2]  }
  0x13   : > { %p629_p12 = scmp.ne.s32.totalorder (!%p207_p10), %s410_s26, %s628_s8 }
  0x14   : > { %v706_v0 = vmov 0.0   ;;  %vm707_vm0 = vmmov 0   ;;  %s791_s29 = scalar_select %p249_p11, %s696_s18, 7  ;;  %vm274_vm1 = vcmask 261120   ;;  %vm321_vm2 = vcmask 64512  }
  0x15   : > { %555 = vmatprep.subr.bf16.mxu0 %v706_v0  ;;  %557 = vmatprep.mubr.msk.bf16.mxu0 %vm707_vm0, %v706_v0  ;;  %vm339_vm3 = vcmask 1043456   ;;  %p630_p13 = pnand %p629_p12, %p774_p4 }
  0x16   : > { %561 = vmatprep.subr.bf16.mxu1 %v706_v0  ;;  %563 = vmatprep.mubr.msk.bf16.mxu1 %vm707_vm0, %v706_v0  ;;  %s541_s30 = sshll.u32 %s791_s29, 2 }
  0x17   : > { %s259_s7 = scalar_lea.vmem %s854_s1, %s541_s30  ;;  %s255_s10 = scalar_lea.vmem %s853_s0, %s541_s30 }
  0x18   : > { %v273_v1 = vld [vmem:[%s259_s7] sm:$0xf]  ;;  %s263_s13 = scalar_lea.vmem %s855_s2, %s541_s30  ;;  %s392_s7 = scalar_lea.sflag [#allocation3], %s246_s14 }
  0x19   : > { %v279_v2 = vsel %vm274_vm1, %v273_v1, 0  ;;  %v272_v3 = vld [vmem:[%s255_s10] sm:$0xf]  ;;  %p631_p0 = pneg %p630_p13  ;;  %s632_s10 = sshll.u32 %s708_s9, 4  ;;  %s633_s10 = int_to_ptr.vmem [resolvable:$false] %s632_s10 }
  0x1a   : > { %556 = vmatpush3.bf16.xpose.msra.mxu0 %v279_v2  ;;  %v335_v14 = vld [vmem:[%s263_s13] sm:$0xf]  ;;  %s634_s11 = scalar_lea.vmem %s633_s10, 256  ;;  %p635_p1 = scmp.lt.s32.totalorder %s410_s26, %s633_s10 }
  0x1b   : > { %v341_v15 = vsel %vm339_vm3, %v335_v14, 0  ;;  %p636_p2 = scmp.lt.s32.totalorder %s634_s11, %s628_s8 }
  0x1c   : > { %562 = vmatpush3.bf16.msra.mxu1 %v341_v15 }
  0x1d   : > { %p637_p3 = por %p636_p2, %p635_p1 }
  0x1f   : > { %p638_p5 = pnand %p637_p3, %p631_p0 }
  0x21   : > { %558 = vmatmul.mubr.msk.bf16.vlgmr.msra.gmra.mxu0 %vm274_vm1, %v272_v3 }
  0xe1   : > { %v315_v4 = vpop.f32.mrf.mxu0 }
  0xe2   : > { %v322_v5 = vsel %vm321_vm2, %v315_v4, -inf }
  0xe3   : > { %323 = vmax.xlane.f32.xlu0 %v322_v5  ;;  %v559_v6 = vpop.f32.mrf.mxu0 }
  0xe5   : > { %v318_v7 = vpop.f32.mrf.mxu0 }
  0xe7   : > { %v560_v8 = vpop.f32.mrf.mxu0 }
 0x16c   : > { %v324_v9 = vpop.xlane.xlu0 %323 }
 0x16d   : > { %v325_v10 = vsub.f32 %v315_v4, %v324_v9 }
 0x16f   : > { %v326_v11 = vmul.f32 1.442695, %v325_v10 }
 0x171   : > { %624 = vpow2.f32 %v326_v11 }
 0x17e   : > { %v625_v12 = vpop.eup %624 }
 0x17f   : > { %v328_v13 = vsel %vm321_vm2, %v625_v12, 0.0 }
 0x180   : > { %329 = vadd.xlane.f32.xlu0 %v328_v13 }
 0x209   : > { %v330_v16 = vpop.xlane.xlu0 %329 }
 0x20a   : > { %626 = vrcp.f32 %v330_v16 }
 0x217   : > { %v627_v17 = vpop.eup %626 }
 0x218   : > { %v332_v18 = vmul.f32 %v627_v17, %v625_v12 }
 0x21a   : > { %v334_v19 = vpack.c.bf16 %v332_v18, %v332_v18  ;;  %333 = vst.msk [vmem:[%s248_s22] sm:$0xff] %vm321_vm2, %v332_v18 }
 0x21c   : > { %564 = vmatmul.mubr.msk.bf16.vlgmr.msra.gmra.mxu1 %vm321_vm2, %v334_v19 }
 0x21d   : > { %641 = shalt.err (!%p638_p5)
}
 0x21e   : > { %s642_s18 = scalar_lea.hbm %s407_s6, 128  ;;  %s646_s14 = scalar_lea.hbm %s857_s4, 1024 }
 0x21f   : > { %p643_p6 = scmp.ne.s32.totalorder %s407_s6, %s642_s18  ;;  %p647_p10 = scmp.lt.s32.totalorder %s407_s6, %s857_s4 }
 0x220   : > { %p648_p11 = scmp.lt.s32.totalorder %s646_s14, %s642_s18 }
 0x221   : > { %p644_p7 = pnand %p643_p6, %p774_p4 }
 0x222   : > { %p649_p12 = por %p648_p11, %p647_p10 }
 0x223   : > { %p645_p9 = pneg %p644_p7 }
 0x225   : > { %p650_p13 = pnand %p649_p12, %p645_p9 }
 0x227   : > { %653 = shalt.err (!%p650_p13)
}
 0x228   : > { %567 = dma.vmem_to_hbm [thread:$0]  (%p774_p4), %s410_s26, 128, %s407_s6, %s392_s7  }
 0x229   : > { %s544_s24 = sshll.u32 %s791_s29, 3 }
 0x22a   : > { %s270_s8 = scalar_lea.vmem %s856_s3, %s544_s24 }
 0x2dc   : > { %v377_v20 = vpop.f32.mrf.mxu1 }
 0x2dd   : > { %383 = vst.msk [vmem:[%s270_s8] sm:$0xff] %vm274_vm1, %v377_v20 }
 0x2de   : > { %v565_v21 = vpop.f32.mrf.mxu1 }
 0x2e0   : > { %v380_v22 = vpop.f32.mrf.mxu1 }
 0x2e2   : > { %v566_v23 = vpop.f32.mrf.mxu1 }
 0x2e3 PF: > { %p573_p0 = scmp.ge.s32.totalorder %s704_s20, 2  ;;  %s431_s9 = sand.u32 1, %s684_s15  }
 0x2e4   : > { %s432_s25 = scalar_lea.sflag [#allocation3], %s431_s9 }
 0x2e5   : > { %p570_p1 = pnand %p573_p0, %p781_p8 }
 0x2e7   : > { %p571_p4 = pneg %p570_p1 }
 0x2e9   : > { %679 = dma.done.wait (%p571_p4), %s432_s25, 128  }
 0x2ea   : > { %681 = vsyncadd (%p571_p4), %s432_s25, 4294967168  ;;  %s18_s20 = sadd.s32 1, %s704_s20   ;;  %s860_s15 = smov %s688_s16 }
 0x2eb   : > { %p15_p2 = scmp.ge.s32.totalorder %s18_s20, 10   ;;  %s861_s16 = smov %s692_s17 }
 0x2ec   : > { %s862_s17 = smov %s787_s28  ;;  %s863_s18 = smov %s700_s19 }
 0x2ed   : > { %s864_s19 = smov %s866_s23  ;;  %17 = sbr.rel (!%p15_p2) target bundleno = 4 (0x4), region = 85 }
 0x2f2   :  { %437 = vsyncpa [#allocation3], 1 }
 0x2f3   :  { %439 = vsyncpa [#allocation3 + $0x1], 1 }

// kernel: multi_head_attention.2
= control target key start
LH: loop header
LB: loop body
LE: loop exit
PB: predicated region body
PF: predicated region fallthrough
CT: control target
= control target key end

     0   :  { %17 = vsyncpa [#allocation3], 0  ;;  %s868_s0 = inlined_call_operand.vmem [shape: f32[16,128], index: 0, kind: input, shape index: {}]   ;;  %s869_s1 = inlined_call_operand.hbm [shape: f32[16,128], index: 1, kind: input, shape index: {}]   ;;  %s870_s2 = inlined_call_operand.hbm [shape: f32[16,128], index: 2, kind: input, shape index: {}]   ;;  %s871_s3 = inlined_call_operand.hbm [shape: f32[128,128], index: 3, kind: input, shape index: {}]   ;;  %s872_s4 = inlined_call_operand.hbm [shape: f32[128,128], index: 4, kind: input, shape index: {}]   ;;  %s873_s5 = inlined_call_operand.hbm [shape: f32[128,128], index: 5, kind: input, shape index: {}]   ;;  %s874_s6 = inlined_call_operand.hbm [shape: f32[1,128], index: 6, kind: input, shape index: {}]   ;;  %s875_s7 = inlined_call_operand.hbm [shape: f32[1,128], index: 7, kind: input, shape index: {}]   ;;  %s876_s8 = inlined_call_operand.hbm [shape: f32[1,128], index: 8, kind: input, shape index: {}]   ;;  %s877_s9 = inlined_call_operand.vmem [shape: bf16[16,128], index: 9, kind: output, shape index: {0}]   ;;  %s878_s10 = inlined_call_operand.vmem [shape: bf16[16,128], index: 10, kind: output, shape index: {1}]   ;;  %s879_s11 = inlined_call_operand.vmem [shape: bf16[16,128], index: 11, kind: output, shape index: {2}]  }
   0x1   :  { %18 = vsyncpa [#allocation5], 0 }
   0x2   :  { %19 = vsyncpa [#allocation8], 0 }
   0x3   :  { %20 = vsyncpa [#allocation11], 0 }
   0x4   :  { %21 = vsyncpa [#allocation14], 0  ;;  %s712_s17 = smov [#allocation4]   ;;  %s713_s19 = smov [#allocation7]  }
   0x5   :  { %s41_s18 = sshll.u32 %s712_s17, 4  ;;  %s65_s20 = sshll.u32 %s713_s19, 4  ;;  %s42_s18 = int_to_ptr.vmem [resolvable:$true] %s41_s18  ;;  %s66_s20 = int_to_ptr.vmem [resolvable:$true] %s65_s20 }
   0x6   :  { %s550_s21 = scalar_lea.vmem %s42_s18, 256  ;;  %p555_p1 = scmp.lt.s32.totalorder %s42_s18, %s42_s18 }
   0x7   :  { %p551_p0 = scmp.ne.s32.totalorder %s42_s18, %s550_s21  ;;  %p556_p2 = scmp.lt.s32.totalorder %s550_s21, %s550_s21 }
   0x9   :  { %p557_p3 = por %p556_p2, %p555_p1 }
   0xb   :  { %p558_p4 = pnand %p557_p3, %p551_p0 }
   0xd   :  { %561 = shalt.err (!%p558_p4)
}
   0xe   :  { %s714_s22 = smov 128   ;;  %s715_s23 = smov 8  }
   0xf   :  { %47 = dma.hbm_to_vmem [thread:$0]  %s870_s2, 256, %s42_s18, [#allocation5], %s714_s22, %s714_s22, %s715_s23  }
  0x10   :  { %s570_s26 = scalar_lea.vmem %s66_s20, 2048  ;;  %p575_p6 = scmp.lt.s32.totalorder %s66_s20, %s66_s20 }
  0x11   :  { %p571_p5 = scmp.ne.s32.totalorder %s66_s20, %s570_s26  ;;  %p576_p7 = scmp.lt.s32.totalorder %s570_s26, %s570_s26 }
  0x13   :  { %p577_p8 = por %p576_p7, %p575_p6 }
  0x15   :  { %p578_p9 = pnand %p577_p8, %p571_p5 }
  0x17   :  { %581 = shalt.err (!%p578_p9)
}
  0x18   :  { %71 = dma.hbm_to_vmem [thread:$0]  %s872_s4, 2048, %s66_s20, [#allocation8], %s714_s22, %s714_s22, %s715_s23  }
  0x19   :  { %s716_s29 = smov [#allocation10]   ;;  %s717_s12 = smov [#allocation2]  }
  0x1a   :  { %s90_s30 = sshll.u32 %s716_s29, 4  ;;  %s29_s13 = sshll.u32 %s717_s12, 4  ;;  %s91_s30 = int_to_ptr.vmem [resolvable:$true] %s90_s30  ;;  %s30_s13 = int_to_ptr.vmem [resolvable:$true] %s29_s13 }
  0x1b   :  { %s590_s2 = scalar_lea.vmem %s91_s30, 16  ;;  %s594_s14 = scalar_lea.vmem %s91_s30, 32 }
  0x1c   :  { %p591_p10 = scmp.ne.s32.totalorder %s91_s30, %s590_s2  ;;  %p595_p11 = scmp.lt.s32.totalorder %s91_s30, %s91_s30 }
  0x1d   :  { %p596_p12 = scmp.lt.s32.totalorder %s594_s14, %s590_s2 }
  0x1f   :  { %p597_p13 = por %p596_p12, %p595_p11 }
  0x21   :  { %p598_p0 = pnand %p597_p13, %p591_p10 }
  0x23   :  { %601 = shalt.err (!%p598_p0)
}
  0x24   :  { %93 = dma.hbm_to_vmem [thread:$0]  %s874_s6, 16, %s91_s30, [#allocation11]  }
  0x25   :  { %s610_s17 = scalar_lea.vmem %s30_s13, 256  ;;  %p615_p2 = scmp.lt.s32.totalorder %s30_s13, %s30_s13 }
  0x26   :  { %p611_p1 = scmp.ne.s32.totalorder %s30_s13, %s610_s17  ;;  %p616_p3 = scmp.lt.s32.totalorder %s610_s17, %s610_s17 }
  0x28   :  { %p617_p4 = por %p616_p3, %p615_p2 }
  0x2a   :  { %p618_p5 = pnand %p617_p4, %p611_p1 }
  0x2c   :  { %621 = shalt.err (!%p618_p5)
}
  0x2d   :  { %35 = dma.hbm_to_vmem [thread:$0]  %s869_s1, 256, %s30_s13, [#allocation3], %s714_s22, %s714_s22, %s715_s23  }
  0x2e   :  { %s718_s19 = smov [#allocation6]   ;;  %s719_s21 = smov [#allocation9]  }
  0x2f   :  { %s53_s20 = sshll.u32 %s718_s19, 4  ;;  %s77_s24 = sshll.u32 %s719_s21, 4  ;;  %s54_s20 = int_to_ptr.vmem [resolvable:$true] %s53_s20  ;;  %s78_s24 = int_to_ptr.vmem [resolvable:$true] %s77_s24 }
  0x30   :  { %s630_s6 = scalar_lea.vmem %s54_s20, 2048  ;;  %p635_p7 = scmp.lt.s32.totalorder %s54_s20, %s54_s20 }
  0x31   :  { %p631_p6 = scmp.ne.s32.totalorder %s54_s20, %s630_s6  ;;  %p636_p8 = scmp.lt.s32.totalorder %s630_s6, %s630_s6 }
  0x33   :  { %p637_p9 = por %p636_p8, %p635_p7 }
  0x35   :  { %p638_p10 = pnand %p637_p9, %p631_p6 }
  0x37   :  { %641 = shalt.err (!%p638_p10)
}
  0x38   :  { %59 = dma.hbm_to_vmem [thread:$0]  %s871_s3, 2048, %s54_s20, [#allocation5], %s714_s22, %s714_s22, %s715_s23  }
  0x39   :  { %s650_s1 = scalar_lea.vmem %s78_s24, 2048  ;;  %p655_p12 = scmp.lt.s32.totalorder %s78_s24, %s78_s24 }
  0x3a   :  { %p651_p11 = scmp.ne.s32.totalorder %s78_s24, %s650_s1  ;;  %p656_p13 = scmp.lt.s32.totalorder %s650_s1, %s650_s1 }
  0x3c   :  { %p657_p0 = por %p656_p13, %p655_p12 }
  0x3e   :  { %p658_p1 = pnand %p657_p0, %p651_p11 }
  0x40   :  { %661 = shalt.err (!%p658_p1)
}
  0x41   :  { %83 = dma.hbm_to_vmem [thread:$0]  %s873_s5, 2048, %s78_s24, [#allocation8], %s714_s22, %s714_s22, %s715_s23  }
  0x42   :  { %s720_s29 = smov [#allocation12]   ;;  %s721_s12 = smov [#allocation13]  }
  0x43   :  { %s100_s30 = sshll.u32 %s720_s29, 4  ;;  %s110_s13 = sshll.u32 %s721_s12, 4  ;;  %s101_s30 = int_to_ptr.vmem [resolvable:$true] %s100_s30  ;;  %s111_s13 = int_to_ptr.vmem [resolvable:$true] %s110_s13 }
  0x44   :  { %s670_s3 = scalar_lea.vmem %s101_s30, 16  ;;  %s674_s2 = scalar_lea.vmem %s101_s30, 32 }
  0x45   :  { %p671_p2 = scmp.ne.s32.totalorder %s101_s30, %s670_s3  ;;  %p675_p3 = scmp.lt.s32.totalorder %s101_s30, %s101_s30 }
  0x46   :  { %p676_p4 = scmp.lt.s32.totalorder %s674_s2, %s670_s3 }
  0x48   :  { %p677_p5 = por %p676_p4, %p675_p3 }
  0x4a   :  { %p678_p6 = pnand %p677_p5, %p671_p2 }
  0x4c   :  { %681 = shalt.err (!%p678_p6)
}
  0x4d   :  { %103 = dma.hbm_to_vmem [thread:$0]  %s875_s7, 16, %s101_s30, [#allocation11]  }
  0x4e   :  { %s690_s16 = scalar_lea.vmem %s111_s13, 16  ;;  %s694_s5 = scalar_lea.vmem %s111_s13, 32 }
  0x4f   :  { %p691_p7 = scmp.ne.s32.totalorder %s111_s13, %s690_s16  ;;  %p695_p8 = scmp.lt.s32.totalorder %s111_s13, %s111_s13 }
  0x50   :  { %p696_p9 = scmp.lt.s32.totalorder %s694_s5, %s690_s16 }
  0x52   :  { %p697_p10 = por %p696_p9, %p695_p8 }
  0x54   :  { %p698_p11 = pnand %p697_p10, %p691_p7 }
  0x56   :  { %701 = shalt.err (!%p698_p11)
}
  0x57   :  { %113 = dma.hbm_to_vmem [thread:$0]  %s876_s8, 16, %s111_s13, [#allocation14]  }
  0x58   :  { %702 = dma.done.wait [#allocation3], 256  }
  0x59   :  { %703 = vsyncadd [#allocation3], 4294967040 }
  0x5a   :  { %704 = dma.done.wait [#allocation5], 2304  }
  0x5b   :  { %705 = vsyncadd [#allocation5], 4294964992 }
  0x5c   :  { %706 = dma.done.wait [#allocation8], 4096  }
  0x5d   :  { %707 = vsyncadd [#allocation8], 4294963200 }
  0x5e   :  { %708 = dma.done.wait [#allocation11], 32  }
  0x5f   :  { %709 = vsyncadd [#allocation11], 4294967264 }
  0x60   :  { %710 = dma.done.wait [#allocation14], 16  }
  0x61   :  { %711 = vsyncadd [#allocation14], 4294967280  ;;  %v722_v0 = vmov 0.0   ;;  %vm723_vm0 = vmmov 0   ;;  %v156_v1 = vld [vmem:[#allocation6 + $0x70] sm:$0xff]  ;;  %v157_v2 = vld [vmem:[#allocation6 + $0x78] sm:$0xff] }
  0x62   :  { %470 = vmatprep.subr.bf16.mxu0 %v722_v0  ;;  %490 = vmatprep.subr.bf16.mxu1 %v722_v0  ;;  %v154_v3 = vld [vmem:[#allocation6 + $0x60] sm:$0xff]  ;;  %v165_v4 = vpack.c.bf16 %v157_v2, %v156_v1  ;;  %v155_v5 = vld [vmem:[#allocation6 + $0x68] sm:$0xff]  ;;  %v152_v7 = vld [vmem:[#allocation6 + $0x50] sm:$0xff] }
  0x63   :  { %486 = vmatprep.mubr.msk.bf16.mxu0 %vm723_vm0, %v722_v0  ;;  %506 = vmatprep.mubr.msk.bf16.mxu1 %vm723_vm0, %v722_v0  ;;  %v164_v6 = vpack.c.bf16 %v155_v5, %v154_v3  ;;  %v153_v8 = vld [vmem:[#allocation6 + $0x58] sm:$0xff]  ;;  %v233_v9 = vld [vmem:[#allocation7 + $0x70] sm:$0xff]  ;;  %v231_v12 = vld [vmem:[#allocation7 + $0x60] sm:$0xff] }
  0x64   :  { %471 = vmatpush3.bf16.msra.mxu0 %v165_v4  ;;  %v234_v10 = vld [vmem:[#allocation7 + $0x78] sm:$0xff]  ;;  %v232_v13 = vld [vmem:[#allocation7 + $0x68] sm:$0xff]  ;;  %v163_v14 = vpack.c.bf16 %v153_v8, %v152_v7  ;;  %v150_v15 = vld [vmem:[#allocation6 + $0x40] sm:$0xff] }
  0x65   :  { %472 = vmatprep.subr.bf16.mxu0 %v722_v0  ;;  %v242_v11 = vpack.c.bf16 %v234_v10, %v233_v9  ;;  %v151_v16 = vld [vmem:[#allocation6 + $0x48] sm:$0xff]  ;;  %v241_v17 = vpack.c.bf16 %v232_v13, %v231_v12  ;;  %v229_v18 = vld [vmem:[#allocation7 + $0x50] sm:$0xff]  ;;  %v230_v19 = vld [vmem:[#allocation7 + $0x58] sm:$0xff] }
  0x66   :  { %v162_v20 = vpack.c.bf16 %v151_v16, %v150_v15  ;;  %v148_v21 = vld [vmem:[#allocation6 + $0x30] sm:$0xff]  ;;  %v149_v22 = vld [vmem:[#allocation6 + $0x38] sm:$0xff]  ;;  %v240_v23 = vpack.c.bf16 %v230_v19, %v229_v18  ;;  %v227_v24 = vld [vmem:[#allocation7 + $0x40] sm:$0xff] }
  0x67   :  { %491 = vmatpush3.bf16.msra.mxu1 %v242_v11  ;;  %v228_v25 = vld [vmem:[#allocation7 + $0x48] sm:$0xff]  ;;  %v161_v26 = vpack.c.bf16 %v149_v22, %v148_v21  ;;  %v146_v27 = vld [vmem:[#allocation6 + $0x20] sm:$0xff]  ;;  %v225_v30 = vld [vmem:[#allocation7 + $0x30] sm:$0xff] }
  0x68   :  { %473 = vmatpush3.bf16.msra.mxu0 %v164_v6  ;;  %492 = vmatprep.subr.bf16.mxu1 %v722_v0  ;;  %v147_v28 = vld [vmem:[#allocation6 + $0x28] sm:$0xff]  ;;  %v239_v29 = vpack.c.bf16 %v228_v25, %v227_v24  ;;  %v226_v31 = vld [vmem:[#allocation7 + $0x38] sm:$0xff]  ;;  %v144_v33 = vld [vmem:[#allocation6 + $0x10] sm:$0xff] }
  0x69   :  { %474 = vmatprep.subr.bf16.mxu0 %v722_v0  ;;  %v160_v32 = vpack.c.bf16 %v147_v28, %v146_v27  ;;  %v145_v34 = vld [vmem:[#allocation6 + $0x18] sm:$0xff]  ;;  %v238_v35 = vpack.c.bf16 %v226_v31, %v225_v30  ;;  %v223_v36 = vld [vmem:[#allocation7 + $0x20] sm:$0xff]  ;;  %v224_v37 = vld [vmem:[#allocation7 + $0x28] sm:$0xff] }
  0x6a   :  { %v159_v38 = vpack.c.bf16 %v145_v34, %v144_v33  ;;  %v142_v39 = vld [vmem:[#allocation6] sm:$0xff]  ;;  %v143_v40 = vld [vmem:[#allocation6 + $0x8] sm:$0xff]  ;;  %v237_v41 = vpack.c.bf16 %v224_v37, %v223_v36  ;;  %v221_v42 = vld [vmem:[#allocation7 + $0x10] sm:$0xff] }
  0x6b   :  { %493 = vmatpush3.bf16.msra.mxu1 %v241_v17  ;;  %v222_v43 = vld [vmem:[#allocation7 + $0x18] sm:$0xff]  ;;  %v158_v44 = vpack.c.bf16 %v143_v40, %v142_v39  ;;  %v139_v45 = vld [vmem:[%s868_s0] sm:$0xff]  ;;  %v140_v46 = vld [vmem:[%s868_s0 + $0x8] sm:$0xff] }
  0x6c   :  { %475 = vmatpush3.bf16.msra.mxu0 %v163_v14  ;;  %494 = vmatprep.subr.bf16.mxu1 %v722_v0  ;;  %v308_v47 = vld [vmem:[#allocation9 + $0x70] sm:$0xff]  ;;  %v309_v48 = vld [vmem:[#allocation9 + $0x78] sm:$0xff]  ;;  %v236_v49 = vpack.c.bf16 %v222_v43, %v221_v42  ;;  %v219_v50 = vld [vmem:[#allocation7] sm:$0xff]  ;;  %v141_v52 = vpack.c.bf16 %v140_v46, %v139_v45 }
  0x6d   :  { %476 = vmatprep.subr.bf16.mxu0 %v722_v0  ;;  %v220_v51 = vld [vmem:[#allocation7 + $0x8] sm:$0xff]  ;;  %v317_v53 = vpack.c.bf16 %v309_v48, %v308_v47  ;;  %v306_v54 = vld [vmem:[#allocation9 + $0x60] sm:$0xff]  ;;  %v304_v61 = vld [vmem:[#allocation9 + $0x50] sm:$0xff] }
  0x6e   :  { %v307_v55 = vld [vmem:[#allocation9 + $0x68] sm:$0xff]  ;;  %v235_v56 = vpack.c.bf16 %v220_v51, %v219_v50  ;;  %v216_v57 = vld [vmem:[#allocation2] sm:$0xff]  ;;  %v305_v62 = vld [vmem:[#allocation9 + $0x58] sm:$0xff] }
  0x6f   :  { %495 = vmatpush3.bf16.msra.mxu1 %v240_v23  ;;  %v217_v58 = vld [vmem:[#allocation2 + $0x8] sm:$0xff]  ;;  %v316_v59 = vpack.c.bf16 %v307_v55, %v306_v54  ;;  %v315_v63 = vpack.c.bf16 %v305_v62, %v304_v61  ;;  %v302_v1 = vld [vmem:[#allocation9 + $0x40] sm:$0xff]  ;;  %v300_v4 = vld [vmem:[#allocation9 + $0x30] sm:$0xff] }
  0x70   :  { %477 = vmatpush3.bf16.msra.mxu0 %v162_v20  ;;  %496 = vmatprep.subr.bf16.mxu1 %v722_v0  ;;  %v218_v60 = vpack.c.bf16 %v217_v58, %v216_v57  ;;  %v303_v2 = vld [vmem:[#allocation9 + $0x48] sm:$0xff]  ;;  %v301_v5 = vld [vmem:[#allocation9 + $0x38] sm:$0xff]  ;;  %v298_v7 = vld [vmem:[#allocation9 + $0x20] sm:$0xff] }
  0x71   :  { %478 = vmatprep.subr.bf16.mxu0 %v722_v0  ;;  %v314_v3 = vpack.c.bf16 %v303_v2, %v302_v1  ;;  %v313_v6 = vpack.c.bf16 %v301_v5, %v300_v4  ;;  %v299_v8 = vld [vmem:[#allocation9 + $0x28] sm:$0xff]  ;;  %v296_v10 = vld [vmem:[#allocation9 + $0x10] sm:$0xff]  ;;  %v297_v11 = vld [vmem:[#allocation9 + $0x18] sm:$0xff] }
  0x72   :  { %v312_v9 = vpack.c.bf16 %v299_v8, %v298_v7  ;;  %v311_v12 = vpack.c.bf16 %v297_v11, %v296_v10  ;;  %v294_v13 = vld [vmem:[#allocation9] sm:$0xff]  ;;  %v295_v14 = vld [vmem:[#allocation9 + $0x8] sm:$0xff]  ;;  %v291_v16 = vld [vmem:[#allocation4] sm:$0xff] }
  0x73   :  { %497 = vmatpush3.bf16.msra.mxu1 %v239_v29  ;;  %v310_v15 = vpack.c.bf16 %v295_v14, %v294_v13  ;;  %v292_v17 = vld [vmem:[#allocation4 + $0x8] sm:$0xff]  ;;  %v413_v19 = vld [vmem:[#allocation10] ss:$0 sm:$0xff]  ;;  %v414_v25 = vld [vmem:[#allocation12] ss:$0 sm:$0xff] }
  0x74   :  { %479 = vmatpush3.bf16.msra.mxu0 %v161_v26  ;;  %498 = vmatprep.subr.bf16.mxu1 %v722_v0  ;;  %v293_v18 = vpack.c.bf16 %v292_v17, %v291_v16  ;;  %v415_v37 = vld [vmem:[#allocation13] ss:$0 sm:$0xff] }
  0x75   :  { %480 = vmatprep.subr.bf16.mxu0 %v722_v0 }
  0x77   :  { %499 = vmatpush3.bf16.msra.mxu1 %v238_v35 }
  0x78   :  { %481 = vmatpush3.bf16.msra.mxu0 %v160_v32  ;;  %500 = vmatprep.subr.bf16.mxu1 %v722_v0 }
  0x79   :  { %482 = vmatprep.subr.bf16.mxu0 %v722_v0 }
  0x7b   :  { %501 = vmatpush3.bf16.msra.mxu1 %v237_v41 }
  0x7c   :  { %483 = vmatpush3.bf16.msra.mxu0 %v159_v38  ;;  %502 = vmatprep.subr.bf16.mxu1 %v722_v0 }
  0x7d   :  { %484 = vmatprep.subr.bf16.mxu0 %v722_v0 }
  0x7f   :  { %503 = vmatpush3.bf16.msra.mxu1 %v236_v49 }
  0x80   :  { %485 = vmatpush3.bf16.msra.mxu0 %v158_v44  ;;  %504 = vmatprep.subr.bf16.mxu1 %v722_v0 }
  0x81   :  { %510 = vmatprep.subr.bf16.mxu0 %v722_v0 }
  0x83   :  { %487 = vmatmul.mubr.bf16.vlgmr.msra.gmra.mxu0 %v141_v52  ;;  %505 = vmatpush3.bf16.msra.mxu1 %v235_v56 }
  0x84   :  { %511 = vmatpush3.bf16.msra.mxu0 %v317_v53  ;;  %526 = vmatprep.mubr.msk.bf16.mxu0 %vm723_vm0, %v722_v0 }
  0x85   :  { %512 = vmatprep.subr.bf16.mxu0 %v722_v0 }
  0x86   :  { %507 = vmatmul.mubr.bf16.vlgmr.msra.gmra.mxu1 %v218_v60 }
  0x88   :  { %513 = vmatpush3.bf16.msra.mxu0 %v316_v59 }
  0x89   :  { %514 = vmatprep.subr.bf16.mxu0 %v722_v0 }
  0x8c   :  { %515 = vmatpush3.bf16.msra.mxu0 %v315_v63 }
  0x8d   :  { %516 = vmatprep.subr.bf16.mxu0 %v722_v0 }
  0x90   :  { %517 = vmatpush3.bf16.msra.mxu0 %v314_v3 }
  0x91   :  { %518 = vmatprep.subr.bf16.mxu0 %v722_v0 }
  0x94   :  { %519 = vmatpush3.bf16.msra.mxu0 %v313_v6 }
  0x95   :  { %520 = vmatprep.subr.bf16.mxu0 %v722_v0 }
  0x98   :  { %521 = vmatpush3.bf16.msra.mxu0 %v312_v9 }
  0x99   :  { %522 = vmatprep.subr.bf16.mxu0 %v722_v0 }
  0x9c   :  { %523 = vmatpush3.bf16.msra.mxu0 %v311_v12 }
  0x9d   :  { %524 = vmatprep.subr.bf16.mxu0 %v722_v0 }
  0xa0   :  { %525 = vmatpush3.bf16.msra.mxu0 %v310_v15 }
  0xa3   :  { %527 = vmatmul.mubr.bf16.vlgmr.msra.gmra.mxu0 %v293_v18 }
 0x143   :  { %v207_v20 = vpop.f32.mrf.mxu0 }
 0x144   :  { %v208_v22 = vadd.f32 %v413_v19, %v207_v20 }
 0x145   :  { %v488_v21 = vpop.f32.mrf.mxu0 }
 0x146   :  { %v284_v26 = vpop.f32.mrf.mxu1  ;;  %v214_v28 = vmul.f32 0.17677669, %v208_v22 }
 0x147   :  { %v210_v23 = vpop.f32.mrf.mxu0  ;;  %v285_v31 = vadd.f32 %v414_v25, %v284_v26 }
 0x148   :  { %v211_v24 = vadd.f32 %v413_v19, %v210_v23  ;;  %v508_v30 = vpop.f32.mrf.mxu1 }
 0x149   :  { %v489_v27 = vpop.f32.mrf.mxu0 }
 0x14a   :  { %v215_v29 = vmul.f32 0.17677669, %v211_v24  ;;  %v287_v33 = vpop.f32.mrf.mxu1 }
 0x14b   :  { %v288_v34 = vadd.f32 %v414_v25, %v287_v33 }
 0x14c   :  { %v431_v32 = vpack.c.bf16 %v215_v29, %v214_v28  ;;  %v509_v0 = vpop.f32.mrf.mxu1 }
 0x14d   :  { %v436_v35 = vpack.c.bf16 %v288_v34, %v285_v31 }
 0x14e   :  { %432 = vst [vmem:[%s877_s9] sm:$0xff] %v431_v32  }
 0x14f   :  { %437 = vst [vmem:[%s878_s10] sm:$0xff] %v436_v35  }
 0x163   :  { %v359_v36 = vpop.f32.mrf.mxu0 }
 0x164   :  { %v360_v40 = vadd.f32 %v415_v37, %v359_v36 }
 0x165   :  { %v528_v38 = vpop.f32.mrf.mxu0 }
 0x167   :  { %v362_v39 = vpop.f32.mrf.mxu0 }
 0x168   :  { %v363_v41 = vadd.f32 %v415_v37, %v362_v39 }
 0x169   :  { %v529_v42 = vpop.f32.mrf.mxu0 }
 0x16a   :  { %v441_v43 = vpack.c.bf16 %v363_v41, %v360_v40 }
 0x16c   :  { %442 = vst [vmem:[%s879_s11] sm:$0xff] %v441_v43  }
 0x16d   :  { %408 = vsyncpa [#allocation3], 1 }
 0x16e   :  { %409 = vsyncpa [#allocation5], 1 }
 0x16f   :  { %410 = vsyncpa [#allocation8], 1 }
 0x170   :  { %411 = vsyncpa [#allocation11], 1 }
 0x171   :  { %412 = vsyncpa [#allocation14], 1 }

</bundles_post_ra>
